<compile_context>
chip_gen: v7x
topology: tpu7x:2x2x1
jax: 0.10.0
libtpu: 0.0.40
codegen_flags: <defaults>
</compile_context>

<pallas_src>
import functools

import jax
import jax.numpy as jnp
from jax import lax
from jax.experimental import pallas as pl
from jax.experimental.pallas import tpu as pltpu

_LANE = 128
_SUBLANE = 8
_MAX_REDUCE_BLOCK_ROWS = 4096     # 4096x128 f32 = 2 MiB/input block, ~8 MiB dbl-buffered
_MAX_ELEMWISE_BLOCK_ROWS = 2048   # 3 streams (x, t, out): keep v5e comfortable
_VMEM_LIMIT_BYTES = 40 * 1024 * 1024   # headroom for kernel temporaries; < v7x 64 MiB phys


def _focal_terms(x, t, alpha, gamma):
    # Numerically stable BCE-with-logits: max(x,0) - x*t + log1p(exp(-|x|))
    bce = jnp.maximum(x, 0.0) - x * t + jnp.log1p(jnp.exp(-jnp.abs(x)))
    pt = jnp.exp(-bce)
    one_minus_pt = jnp.maximum(1.0 - pt, 0.0)   # pt can exceed 1 by an ulp
    g = float(gamma)
    if g.is_integer() and 0 <= int(g) <= 8:
        gi = int(g)
        if gi == 0:
            mod = jnp.ones_like(bce)
        else:
            mod = one_minus_pt
            for _ in range(gi - 1):
                mod = mod * one_minus_pt
    else:
        mod = one_minus_pt ** g
    return alpha * mod * bce


def _fold_to_vreg(v):
    # (block_rows, 128) -> (8, 128): leading-axis sum = pure VALU vreg adds, no XLU.
    return jnp.sum(v.reshape(-1, _SUBLANE, _LANE), axis=0)


def _focal_reduce_kernel(x_ref, t_ref, out_ref, acc_ref, *, alpha, gamma,
                         block_rows, last_full_row, tail, needs_mask, fold, scale):
    k = pl.program_id(0)

    @pl.when(k == 0)
    def _():
        acc_ref[...] = jnp.zeros_like(acc_ref)

    x = x_ref[...].astype(jnp.float32)
    t = t_ref[...].astype(jnp.float32)
    fl = _focal_terms(x, t, alpha, gamma)
    fold_fn = _fold_to_vreg if fold else (lambda v: v)

    if not needs_mask:
        # Static: no padded lanes and no ragged last block anywhere.
        acc_ref[...] += fold_fn(fl)
    else:
        # Row-space full-block test: block fully valid iff (k+1)*block_rows*128 <= n.
        is_full = (k + 1) * block_rows <= last_full_row

        @pl.when(is_full)
        def _():
            acc_ref[...] += fold_fn(fl)

        @pl.when(jnp.logical_not(is_full))
        def _():
            # Mask in row/col space (int32-safe for n < 2**38 elements).  Garbage
            # from out-of-bounds / padded reads is selected away, so NaN/Inf cannot
            # leak into the sum.
            row = k * block_rows + lax.broadcasted_iota(jnp.int32, fl.shape, 0)
            col = lax.broadcasted_iota(jnp.int32, fl.shape, 1)
            valid = (row < last_full_row) | ((row == last_full_row) & (col < tail))
            acc_ref[...] += fold_fn(jnp.where(valid, fl, 0.0))

    @pl.when(k == pl.num_programs(0) - 1)
    def _():
        total = jnp.sum(acc_ref[...]) * scale     # single cross-lane reduce at the end
        out_ref[...] = jnp.broadcast_to(total, out_ref.shape)


def _focal_elemwise_kernel(x_ref, t_ref, o_ref, *, alpha, gamma):
    x = x_ref[...].astype(jnp.float32)
    t = t_ref[...].astype(jnp.float32)
    o_ref[...] = _focal_terms(x, t, alpha, gamma).astype(o_ref.dtype)


def _to_slab(a, rows):
    """Flatten to a lane-dense (rows, 128) slab.

    Pads (which costs a full copy) ONLY when the element count is not a multiple
    of 128 -- at most 127 padded elements.  bf16/f32 pass through uncopied."""
    if a.dtype not in (jnp.float32, jnp.bfloat16):
        a = a.astype(jnp.float32)
    flat = a.reshape(-1)
    pad = rows * _LANE - flat.shape[0]
    if pad:
        flat = jnp.pad(flat, (0, pad))
    return flat.reshape(rows, _LANE)


def focal_loss(inputs, targets, alpha=1.0, gamma=2.0, reduction="mean",
               _max_block_rows=None):
    """Pallas implementation of FocalLoss.forward (PyTorch semantics)."""
    orig_shape = inputs.shape
    out_dtype = inputs.dtype if inputs.dtype in (jnp.float32, jnp.bfloat16) else jnp.float32
    n = 1
    for d in orig_shape:
        n *= int(d)

    rows = pl.cdiv(n, _LANE)          # lane rows needed to hold n elements
    tail = n % _LANE                  # valid lanes in the last (possibly partial) row
    last_full_row = n // _LANE
    alpha = float(alpha)
    gamma = float(gamma)

    x2 = _to_slab(inputs, rows)
    t2 = _to_slab(targets, rows)

    if reduction in ("mean", "sum"):
        max_rows = _max_block_rows or _MAX_REDUCE_BLOCK_ROWS
        block_rows = rows if rows <= max_rows else max_rows
        steps = pl.cdiv(rows, block_rows)
        needs_mask = (tail != 0) or (rows % block_rows != 0)
        fold = (block_rows % _SUBLANE == 0)
        acc_shape = (_SUBLANE, _LANE) if fold else (block_rows, _LANE)
        scale = (1.0 / n) if reduction == "mean" else 1.0
        blk = (block_rows, _LANE)

        kernel = functools.partial(
            _focal_reduce_kernel, alpha=alpha, gamma=gamma,
            block_rows=block_rows, last_full_row=last_full_row, tail=tail,
            needs_mask=needs_mask, fold=fold, scale=scale)

        out = pl.pallas_call(
            kernel,
            out_shape=jax.ShapeDtypeStruct((_SUBLANE, _LANE), jnp.float32),
            grid_spec=pltpu.PrefetchScalarGridSpec(
                num_scalar_prefetch=0,
                grid=(steps,),
                in_specs=[pl.BlockSpec(blk, lambda k: (k, 0)),
                          pl.BlockSpec(blk, lambda k: (k, 0))],
                out_specs=pl.BlockSpec((_SUBLANE, _LANE), lambda k: (0, 0)),
                scratch_shapes=[pltpu.VMEM(acc_shape, jnp.float32)],
            ),
            compiler_params=pltpu.CompilerParams(
                dimension_semantics=("arbitrary",),
                vmem_limit_bytes=_VMEM_LIMIT_BYTES),
        )(x2, t2)
        return out[0, 0].astype(out_dtype)

    else:  # reduction == 'none' -> elementwise focal loss in the original shape
        max_rows = _max_block_rows or _MAX_ELEMWISE_BLOCK_ROWS
        block_rows = rows if rows <= max_rows else max_rows
        steps = pl.cdiv(rows, block_rows)
        blk = (block_rows, _LANE)

        kernel = functools.partial(_focal_elemwise_kernel, alpha=alpha, gamma=gamma)
        out = pl.pallas_call(
            kernel,
            out_shape=jax.ShapeDtypeStruct((rows, _LANE), out_dtype),
            grid_spec=pltpu.PrefetchScalarGridSpec(
                num_scalar_prefetch=0,
                grid=(steps,),
                in_specs=[pl.BlockSpec(blk, lambda i: (i, 0)),
                          pl.BlockSpec(blk, lambda i: (i, 0))],
                out_specs=pl.BlockSpec(blk, lambda i: (i, 0)),
            ),
            compiler_params=pltpu.CompilerParams(
                dimension_semantics=("parallel",),
                vmem_limit_bytes=_VMEM_LIMIT_BYTES),
        )(x2, t2)
        flat = out.reshape(-1)
        if flat.shape[0] != n:
            flat = flat[:n]           # slice only exists when n % 128 != 0
        return flat.reshape(orig_shape)


def _focal_loss_ref(inputs, targets, alpha=1.0, gamma=2.0, reduction="mean"):
    x = inputs.astype(jnp.float32)
    t = targets.astype(jnp.float32)
    bce = jnp.maximum(x, 0.0) - x * t + jnp.log1p(jnp.exp(-jnp.abs(x)))
    pt = jnp.exp(-bce)
    fl = alpha * (1.0 - pt) ** gamma * bce
    if reduction == "mean":
        return jnp.mean(fl)
    elif reduction == "sum":
        return jnp.sum(fl)
    return fl


if __name__ == "__main__":
    key = jax.random.PRNGKey(0)
    kx, kt = jax.random.split(key)

    # Segmentation-style binary head: (batch=2, channels=4, 16x16 spatial).
    x = jax.random.normal(kx, (2, 4, 16, 16), dtype=jnp.float32)
    targets = jax.random.bernoulli(kt, 0.5, (2, 4, 16, 16)).astype(jnp.float32)

    loss = jax.block_until_ready(
        focal_loss(x, targets, alpha=1.0, gamma=2.0, reduction="mean"))
    ref = _focal_loss_ref(x, targets, alpha=1.0, gamma=2.0, reduction="mean")
    assert jnp.allclose(loss, ref, rtol=1e-5, atol=1e-6), (loss, ref)

    fl_none = jax.block_until_ready(focal_loss(x, targets, reduction="none"))
    assert jnp.allclose(fl_none, _focal_loss_ref(x, targets, reduction="none"),
                        rtol=1e-5, atol=1e-6)

    fl_sum = jax.block_until_ready(focal_loss(x, targets, reduction="sum"))
    assert jnp.allclose(fl_sum, _focal_loss_ref(x, targets, reduction="sum"),
                        rtol=1e-5, atol=1e-5)

    # Ragged case: n % 128 != 0 AND rows % block_rows != 0 -- exercises the in-kernel
    # tail mask and the ragged last block at tiny scale via _max_block_rows.
    kx2, kt2 = jax.random.split(jax.random.PRNGKey(1))
    x_r = jax.random.normal(kx2, (3, 5, 13, 11), dtype=jnp.float32)
    t_r = jax.random.bernoulli(kt2, 0.5, (3, 5, 13, 11)).astype(jnp.float32)
    for red in ("mean", "sum"):
        got = jax.block_until_ready(
            focal_loss(x_r, t_r, reduction=red, _max_block_rows=8))
        want = _focal_loss_ref(x_r, t_r, reduction=red)
        assert jnp.allclose(got, want, rtol=1e-5, atol=1e-5), (red, got, want)
    got_none = jax.block_until_ready(
        focal_loss(x_r, t_r, reduction="none", _max_block_rows=8))
    assert jnp.allclose(got_none, _focal_loss_ref(x_r, t_r, reduction="none"),
                        rtol=1e-5, atol=1e-5)

    print("KERNEL_OK")
</pallas_src>

<mosaic_0001>
module attributes {stable_mosaic.version = 11 : i64} {
  func.func @_focal_reduce_kernel(%arg0: i32, %arg1: memref<16x128xf32, #tpu.memory_space<vmem>>, %arg2: memref<16x128xf32, #tpu.memory_space<vmem>>, %arg3: memref<8x128xf32, #tpu.memory_space<vmem>>, %arg4: memref<8x128xf32, #tpu.memory_space<vmem>>) attributes {dimension_semantics = [#tpu.dimension_semantics<arbitrary>], iteration_bounds = array<i64: 1>, scalar_prefetch = 0 : i64, scratch_operands = 1 : i64, tpu.core_type = #tpu.core_type<tc>, window_params = [{transform_indices = @transform_0, window_bounds = array<i64: 16, 128>}, {transform_indices = @transform_1, window_bounds = array<i64: 16, 128>}, {pipeline_mode = #tpu.pipeline_mode<synchronous>, transform_indices = @transform_2, window_bounds = array<i64: 8, 128>}]} {
    %c0_i32 = arith.constant 0 : i32
    %0 = arith.cmpi eq, %arg0, %c0_i32 : i32
    %1 = arith.extui %0 : i1 to i32
    %c0_i32_0 = arith.constant 0 : i32
    %2 = arith.cmpi ne, %1, %c0_i32_0 : i32
    scf.if %2 {
      %cst_16 = arith.constant 0.000000e+00 : f32
      %34 = vector.broadcast %cst_16 : f32 to vector<8x128xf32>
      %c0_17 = arith.constant 0 : index
      %c0_18 = arith.constant 0 : index
      %35 = vector.load %arg4[%c0_17, %c0_18] : memref<8x128xf32, #tpu.memory_space<vmem>>, vector<8x128xf32>
      tpu.vector_store %arg4[%c0_17, %c0_18], %34 {strides = array<i32>} : memref<8x128xf32, #tpu.memory_space<vmem>>, vector<8x128xf32>,
    } else {
    }
    %c0 = arith.constant 0 : index
    %c0_1 = arith.constant 0 : index
    %3 = vector.load %arg1[%c0, %c0_1] : memref<16x128xf32, #tpu.memory_space<vmem>>, vector<16x128xf32>
    %c0_2 = arith.constant 0 : index
    %c0_3 = arith.constant 0 : index
    %4 = vector.load %arg2[%c0_2, %c0_3] : memref<16x128xf32, #tpu.memory_space<vmem>>, vector<16x128xf32>
    %cst = arith.constant 0.000000e+00 : f32
    %5 = vector.broadcast %cst : f32 to vector<16x128xf32>
    %6 = arith.maximumf %3, %5 : vector<16x128xf32>
    %7 = arith.mulf %3, %4 : vector<16x128xf32>
    %8 = arith.subf %6, %7 : vector<16x128xf32>
    %9 = math.absf %3 : vector<16x128xf32>
    %cst_4 = arith.constant 0.000000e+00 : f32
    %10 = vector.broadcast %cst_4 : f32 to vector<16x128xf32>
    %11 = arith.subf %10, %9 : vector<16x128xf32>
    %12 = math.exp %11 : vector<16x128xf32>
    %13 = math.log1p %12 : vector<16x128xf32>
    %14 = arith.addf %8, %13 : vector<16x128xf32>
    %cst_5 = arith.constant 0.000000e+00 : f32
    %15 = vector.broadcast %cst_5 : f32 to vector<16x128xf32>
    %16 = arith.subf %15, %14 : vector<16x128xf32>
    %17 = math.exp %16 : vector<16x128xf32>
    %cst_6 = arith.constant 1.000000e+00 : f32
    %18 = vector.broadcast %cst_6 : f32 to vector<16x128xf32>
    %19 = arith.subf %18, %17 : vector<16x128xf32>
    %cst_7 = arith.constant 0.000000e+00 : f32
    %20 = vector.broadcast %cst_7 : f32 to vector<16x128xf32>
    %21 = arith.maximumf %19, %20 : vector<16x128xf32>
    %22 = arith.mulf %21, %21 : vector<16x128xf32>
    %cst_8 = arith.constant 1.000000e+00 : f32
    %23 = vector.broadcast %cst_8 : f32 to vector<16x128xf32>
    %24 = arith.mulf %23, %22 : vector<16x128xf32>
    %25 = arith.mulf %24, %14 : vector<16x128xf32>
    %c0_9 = arith.constant 0 : index
    %c0_10 = arith.constant 0 : index
    %26 = vector.load %arg4[%c0_9, %c0_10] : memref<8x128xf32, #tpu.memory_space<vmem>>, vector<8x128xf32>
    %27 = vector.shape_cast %25 : vector<16x128xf32> to vector<2x8x128xf32>
    %cst_11 = arith.constant dense<0.000000e+00> : vector<8x128xf32>
    %28 = vector.multi_reduction <add>, %27, %cst_11 [0] : vector<2x8x128xf32> to vector<8x128xf32>
    %29 = arith.addf %26, %28 : vector<8x128xf32>
    %c0_12 = arith.constant 0 : index
    %c0_13 = arith.constant 0 : index
    %30 = vector.load %arg4[%c0_12, %c0_13] : memref<8x128xf32, #tpu.memory_space<vmem>>, vector<8x128xf32>
    tpu.vector_store %arg4[%c0_12, %c0_13], %29 {strides = array<i32>} : memref<8x128xf32, #tpu.memory_space<vmem>>, vector<8x128xf32>,
    %c0_i32_14 = arith.constant 0 : i32
    %31 = arith.cmpi eq, %arg0, %c0_i32_14 : i32
    %32 = arith.extui %31 : i1 to i32
    %c0_i32_15 = arith.constant 0 : i32
    %33 = arith.cmpi ne, %32, %c0_i32_15 : i32
    scf.if %33 {
      %c0_16 = arith.constant 0 : index
      %c0_17 = arith.constant 0 : index
      %34 = vector.load %arg4[%c0_16, %c0_17] : memref<8x128xf32, #tpu.memory_space<vmem>>, vector<8x128xf32>
      %35 = vector.shape_cast %34 : vector<8x128xf32> to vector<1x8x128xf32>
      %cst_18 = arith.constant dense<0.000000e+00> : vector<1xf32>
      %36 = vector.multi_reduction <add>, %35, %cst_18 [1, 2] : vector<1x8x128xf32> to vector<1xf32>
      %37 = vector.shape_cast %36 : vector<1xf32> to vector<1x1x1xf32>
      %38 = vector.extract %37[0, 0, 0] : f32 from vector<1x1x1xf32>
      %cst_19 = arith.constant 4.8828125E-4 : f32
      %39 = arith.mulf %38, %cst_19 : f32
      %40 = vector.broadcast %39 : f32 to vector<8x128xf32>
      %c0_20 = arith.constant 0 : index
      %c0_21 = arith.constant 0 : index
      %41 = vector.load %arg3[%c0_20, %c0_21] : memref<8x128xf32, #tpu.memory_space<vmem>>, vector<8x128xf32>
      tpu.vector_store %arg3[%c0_20, %c0_21], %40 {strides = array<i32>} : memref<8x128xf32, #tpu.memory_space<vmem>>, vector<8x128xf32>,
    } else {
    }
    return
  }
  func.func @transform_0(%arg0: i32) -> (i32, i32) {
    %c0_i32 = arith.constant 0 : i32
    %c0_i32_0 = arith.constant 0 : i32
    return %arg0, %c0_i32 : i32, i32
  }
  func.func @transform_1(%arg0: i32) -> (i32, i32) {
    %c0_i32 = arith.constant 0 : i32
    %c0_i32_0 = arith.constant 0 : i32
    return %arg0, %c0_i32 : i32, i32
  }
  func.func @transform_2(%arg0: i32) -> (i32, i32) {
    %c0_i32 = arith.constant 0 : i32
    %c0_i32_0 = arith.constant 0 : i32
    %c0_i32_1 = arith.constant 0 : i32
    return %c0_i32, %c0_i32_0 : i32, i32
  }
}

</mosaic_0001>

<bundles_post_ra>
// kernel: tpu_custom_call.1
= control target key start
LH: loop header
LB: loop body
LE: loop exit
PB: predicated region body
PF: predicated region fallthrough
CT: control target
= control target key end

     0   :  { %7 = vsyncpa [#allocation4], 0  ;;  %s280_s0 = inlined_call_operand.hbm [shape: f32[16,128], index: 0, kind: input, shape index: {}]   ;;  %s281_s1 = inlined_call_operand.hbm [shape: f32[16,128], index: 1, kind: input, shape index: {}]   ;;  %s282_s2 = inlined_call_operand.hbm [shape: f32[8,128], index: 2, kind: output, shape index: {}]  }
   0x1   :  { %8 = vsyncpa [#allocation7], 0 }
   0x2   :  { %9 = vsyncpa [#allocation5], 0  ;;  %s224_s9 = smov [#allocation3]   ;;  %s152_s13 = scalar_lea.hbm %s280_s0, 256 }
   0x3   :  { %s15_s10 = sshll.u32 %s224_s9, 4  ;;  %p153_p0 = scmp.ne.s32.totalorder %s280_s0, %s152_s13  ;;  %s16_s10 = int_to_ptr.vmem [resolvable:$true] %s15_s10 }
   0x4   :  { %p156_p1 = scmp.lt.u32.totalorder %s152_s13, %s280_s0 }
   0x6   :  { %p158_p2 = pnand %p156_p1, %p153_p0 }
   0x8   :  { %161 = shalt.err (!%p158_p2)
}
   0x9   :  { %s162_s18 = scalar_lea.vmem %s16_s10, 256  ;;  %p167_p4 = scmp.lt.s32.totalorder %s16_s10, %s16_s10 }
   0xa   :  { %p163_p3 = scmp.ne.s32.totalorder %s16_s10, %s162_s18  ;;  %p168_p5 = scmp.lt.s32.totalorder %s162_s18, %s162_s18 }
   0xc   :  { %p169_p6 = por %p168_p5, %p167_p4 }
   0xe   :  { %p170_p7 = pnand %p169_p6, %p163_p3 }
  0x10   :  { %173 = shalt.err (!%p170_p7)
}
  0x11   :  { %s225_s19 = smov 128   ;;  %s226_s20 = smov 8  }
  0x12   :  { %21 = dma.hbm_to_vmem [thread:$0]  %s280_s0, 256, %s16_s10, [#allocation4], %s225_s19, %s225_s19, %s226_s20  }
  0x13   :  { %s227_s23 = smov [#allocation6]   ;;  %s174_s27 = scalar_lea.hbm %s281_s1, 256 }
  0x14   :  { %s27_s24 = sshll.u32 %s227_s23, 4  ;;  %p175_p8 = scmp.ne.s32.totalorder %s281_s1, %s174_s27  ;;  %s28_s24 = int_to_ptr.vmem [resolvable:$true] %s27_s24 }
  0x15   :  { %p178_p9 = scmp.lt.u32.totalorder %s174_s27, %s281_s1 }
  0x17   :  { %p180_p10 = pnand %p178_p9, %p175_p8 }
  0x19   :  { %183 = shalt.err (!%p180_p10)
}
  0x1a   :  { %s184_s4 = scalar_lea.vmem %s28_s24, 256  ;;  %p189_p12 = scmp.lt.s32.totalorder %s28_s24, %s28_s24 }
  0x1b   :  { %p185_p11 = scmp.ne.s32.totalorder %s28_s24, %s184_s4  ;;  %p190_p13 = scmp.lt.s32.totalorder %s184_s4, %s184_s4 }
  0x1d   :  { %p191_p0 = por %p190_p13, %p189_p12 }
  0x1f   :  { %p192_p1 = pnand %p191_p0, %p185_p11 }
  0x21   :  { %195 = shalt.err (!%p192_p1)
}
  0x22   :  { %33 = dma.hbm_to_vmem [thread:$0]  %s281_s1, 256, %s28_s24, [#allocation7], %s225_s19, %s225_s19, %s226_s20  }
  0x23   :  { %218 = dma.done.wait [#allocation4], 256  }
  0x24   :  { %219 = vsyncadd [#allocation4], 4294967040 }
  0x25   :  { %220 = dma.done.wait [#allocation7], 256  }
  0x26   :  { %221 = vsyncadd [#allocation7], 4294967040  ;;  %v45_v0 = vld [vmem:[#allocation3] sm:$0xff]  ;;  %v46_v1 = vld [vmem:[#allocation3 + $0x8] sm:$0xff]  ;;  %s228_s1 = smov [#allocation8]  }
  0x27   :  { %v55_v2 = vand.u32 2147483647, %v45_v0  ;;  %v56_v3 = vand.u32 2147483647, %v46_v1  ;;  %v47_v14 = vld [vmem:[#allocation6] sm:$0xff]  ;;  %v48_v15 = vld [vmem:[#allocation6 + $0x8] sm:$0xff] }
  0x28   :  { %v49_v17 = vmax.f32 %v45_v0, 0.0  ;;  %v51_v18 = vmul.f32 %v47_v14, %v45_v0  ;;  %v50_v21 = vmax.f32 %v46_v1, 0.0  ;;  %v52_v22 = vmul.f32 %v48_v15, %v46_v1  ;;  %s123_s6 = sshll.u32 %s228_s1, 4  ;;  %s124_s6 = int_to_ptr.vmem [resolvable:$true] %s123_s6 }
  0x29   :  { %v57_v4 = vsub.f32 0.0, %v55_v2  ;;  %v58_v5 = vsub.f32 0.0, %v56_v3  ;;  %s196_s9 = scalar_lea.vmem %s124_s6, 128  ;;  %p201_p3 = scmp.lt.s32.totalorder %s124_s6, %s124_s6 }
  0x2a   :  { %v53_v26 = vsub.f32 %v49_v17, %v51_v18  ;;  %v54_v29 = vsub.f32 %v50_v21, %v52_v22  ;;  %p197_p2 = scmp.ne.s32.totalorder %s124_s6, %s196_s9  ;;  %p202_p4 = scmp.lt.s32.totalorder %s196_s9, %s196_s9 }
  0x2b   :  { %v59_v6 = vmul.f32 1.442695, %v57_v4  ;;  %v61_v7 = vmul.f32 1.442695, %v58_v5 }
  0x2c   :  { %p203_p5 = por %p202_p4, %p201_p3 }
  0x2d   :  { %140 = vpow2.f32 %v59_v6 }
  0x2e   :  { %142 = vpow2.f32 %v61_v7  ;;  %p204_p6 = pnand %p203_p5, %p197_p2 }
  0x37   :  { %v141_v8 = vpop.eup %140 }
  0x38   :  { %v143_v9 = vpop.eup %142  ;;  %v63_v10 = vadd.f32 1.0, %v141_v8  ;;  %v66_v12 = vmul.f32 -0.5, %v141_v8  ;;  %v69_v19 = vand.u32 2147483647, %v141_v8 }
  0x39   :  { %v72_v11 = vadd.f32 1.0, %v143_v9  ;;  %v75_v13 = vmul.f32 -0.5, %v143_v9  ;;  %v78_v23 = vand.u32 2147483647, %v143_v9 }
  0x3a   :  { %144 = vlog2.f32 %v63_v10  ;;  %v67_v16 = vadd.f32 1.0, %v66_v12  ;;  %vm70_vm0 = vcmp.lt.f32.partialorder %v69_v19, 0.0004427343 }
  0x3b   :  { %146 = vlog2.f32 %v72_v11  ;;  %v76_v20 = vadd.f32 1.0, %v75_v13  ;;  %vm79_vm1 = vcmp.lt.f32.partialorder %v78_v23, 0.0004427343 }
  0x3c   :  { %v68_v24 = vmul.f32 %v141_v8, %v67_v16 }
  0x3d   :  { %v77_v27 = vmul.f32 %v143_v9, %v76_v20 }
  0x44   :  { %v145_v25 = vpop.eup %144 }
  0x45   :  { %v147_v28 = vpop.eup %146  ;;  %v65_v30 = vmul.f32 0.6931472, %v145_v25 }
  0x46   :  { %v74_v31 = vmul.f32 0.6931472, %v147_v28 }
  0x47   :  { %v71_v32 = vsel %vm70_vm0, %v68_v24, %v65_v30 }
  0x48   :  { %v80_v33 = vsel %vm79_vm1, %v77_v27, %v74_v31  ;;  %v81_v34 = vadd.f32 %v71_v32, %v53_v26 }
  0x49   :  { %v82_v35 = vadd.f32 %v80_v33, %v54_v29 }
  0x4a   :  { %v83_v36 = vsub.f32 0.0, %v81_v34 }
  0x4b   :  { %v84_v37 = vsub.f32 0.0, %v82_v35 }
  0x4c   :  { %v85_v38 = vmul.f32 1.442695, %v83_v36 }
  0x4d   :  { %v87_v39 = vmul.f32 1.442695, %v84_v37 }
  0x4e   :  { %148 = vpow2.f32 %v85_v38 }
  0x4f   :  { %150 = vpow2.f32 %v87_v39 }
  0x58   :  { %v149_v40 = vpop.eup %148 }
  0x59   :  { %v151_v41 = vpop.eup %150  ;;  %v89_v42 = vsub.f32 1.0, %v149_v40 }
  0x5a   :  { %v90_v43 = vsub.f32 1.0, %v151_v41 }
  0x5b   :  { %v91_v44 = vmax.f32 %v89_v42, 0.0 }
  0x5c   :  { %v92_v45 = vmax.f32 %v90_v43, 0.0 }
  0x5d   :  { %v93_v46 = vmul.f32 %v91_v44, %v91_v44 }
  0x5e   :  { %v94_v47 = vmul.f32 %v92_v45, %v92_v45 }
  0x5f   :  { %v95_v48 = vmul.f32 %v93_v46, %v81_v34 }
  0x60   :  { %v96_v49 = vmul.f32 %v94_v47, %v82_v35 }
  0x62   :  { %v98_v50 = vadd.f32 %v96_v49, %v95_v48 }
  0x64   :  { %105 = vadd.xlane.f32.xlu0 %v98_v50 }
  0xf1   :  { %v106_v51 = vpop.xlane.xlu0 %105 }
  0xf2   :  { %v107_v52 = vrot.slane %v106_v51, 4 }
  0xf4   :  { %v108_v53 = vadd.f32 %v107_v52, %v106_v51 }
  0xf6   :  { %v109_v54 = vrot.slane %v108_v53, 2 }
  0xf8   :  { %v110_v55 = vadd.f32 %v109_v54, %v108_v53 }
  0xfa   :  { %v111_v56 = vrot.slane %v110_v55, 1 }
  0xfc   :  { %v112_v57 = vadd.f32 %v111_v56, %v110_v55 }
  0xfe   :  { %133 = vpush %v112_v57 }
 0x12f   :  { %s134_s7 = spop %133 }
 0x130   :  { %s114_s8 = smul.f32 0.00048828125, %s134_s7 }
 0x132   :  { %v115_v58 = vstv %s114_s8 }
 0x133   :  { %116 = vst [vmem:[#allocation8] sm:$0xff] %v115_v58 }
 0x134   :  { %207 = shalt.err (!%p204_p6)
}
 0x135   :  { %s208_s12 = scalar_lea.hbm %s282_s2, 128 }
 0x136   :  { %p209_p7 = scmp.ne.s32.totalorder %s282_s2, %s208_s12  ;;  %p212_p8 = scmp.lt.u32.totalorder %s208_s12, %s282_s2 }
 0x138   :  { %p214_p9 = pnand %p212_p8, %p209_p7 }
 0x13a   :  { %217 = shalt.err (!%p214_p9)
}
 0x13b   :  { %126 = dma.vmem_to_hbm [thread:$0]  %s124_s6, 128, %s282_s2, [#allocation5]  }
 0x13c   :  { %222 = dma.done.wait [#allocation5], 128  }
 0x13d   :  { %223 = vsyncadd [#allocation5], 4294967168 }
 0x13e   :  { %130 = vsyncpa [#allocation4], 1 }
 0x13f   :  { %131 = vsyncpa [#allocation7], 1 }
 0x140   :  { %132 = vsyncpa [#allocation5], 1 }

</bundles_post_ra>
